<compile_context>
chip_gen: v5e
topology: v5e:2x2
jax: 0.10.0
libtpu: 0.0.40
codegen_flags: <defaults>
</compile_context>

<pallas_src>
import functools

import jax
import jax.numpy as jnp
from jax.experimental import pallas as pl
from jax.experimental.pallas import tpu as pltpu


# ---------------------------------------------------------------------------
# Kernel
# ---------------------------------------------------------------------------
def _score_xux_kernel(z_ref, w1_ref, b1_ref, w2_ref, b2_ref, w3_ref, b3_ref,
                      out_ref):
    # z_ref: (bm, Dz) natural row tile.  The input normalization is folded
    # into (W1', b1') and the 1/k rescale into (W3', b3') on the host, so the
    # body is a plain MLP:  out = relu(relu(z@W1'+b1')@W2+b2)@W3' + b3'.
    z = z_ref[...]
    h = jnp.dot(z, w1_ref[...], preferred_element_type=jnp.float32) + b1_ref[...]
    h = jnp.maximum(h, 0.0)
    h = jnp.dot(h, w2_ref[...], preferred_element_type=jnp.float32) + b2_ref[...]
    h = jnp.maximum(h, 0.0)
    out_ref[...] = (jnp.dot(h, w3_ref[...], preferred_element_type=jnp.float32)
                    + b3_ref[...])


# ---------------------------------------------------------------------------
# Tiling heuristics
# ---------------------------------------------------------------------------
def _round_up(x, m):
    return ((x + m - 1) // m) * m


def _cdiv(a, b):
    return (a + b - 1) // b


def _tensorcore_count():
    # v7x exposes 2 TensorCores per device; v4/v5p are megacore (2 fused TCs).
    # v5e / v6e have a single TensorCore.  Heuristic on device_kind; on any
    # failure fall back to 1 (always correct, just loses dual-TC sharding).
    try:
        kind = (jax.devices()[0].device_kind or "").lower()
    except Exception:
        return 1
    if "v7" in kind or "v4" in kind or "v5p" in kind:
        return 2
    return 1


_BLOCK_BATCH_CAP = 8192     # rows per grid step (~3.5 MB VMEM footprint)
_MIN_ROWS_PER_CORE = 2048   # only shard across TCs when each core gets
                            # several microseconds of real work (a grid step
                            # costs ~0.35 us of fixed overhead)


def _choose_block_batch(batch, num_cores):
    """Pick (block_batch, n_steps): the fewest overhead-bound grid steps,
    rounded to a multiple of the TensorCore count when there is enough work
    to shard the 'parallel' batch axis across cores (v7x / megacore)."""
    if num_cores > 1 and batch >= num_cores * _MIN_ROWS_PER_CORE:
        n = max(num_cores, _cdiv(batch, _BLOCK_BATCH_CAP))
        n = _round_up(n, num_cores)
    else:
        n = _cdiv(batch, _BLOCK_BATCH_CAP)      # 1 step whenever B <= cap
    block_batch = _round_up(_cdiv(batch, n), 8)  # sublane-aligned rows
    n = _cdiv(batch, block_batch)
    return block_batch, n


# ---------------------------------------------------------------------------
# Parameter folding (exact algebra, do once or let jit fuse it)
# ---------------------------------------------------------------------------
def fold_score_params(k_vec, b_vec, w1, b1, w2, b2, w3, b3):
    """Fold normalizer constants into the first/last MLP layers:
         ((z - b)/k) @ W1 + b1 = z @ (W1 / k^T) + (b1 - (b/k) @ W1)
         (h @ W3 + b3) / k     = h @ (W3 / k)   + b3 / k
    Returns (w1f, b1f, w2f, b2f, w3f, b3f); call once and reuse with
    score_xux_apply, or rely on the jitted forward to fuse these tiny ops."""
    f32 = jnp.float32
    dz, hidden = w1.shape
    k = jnp.asarray(k_vec, f32).reshape(1, dz)
    b = jnp.asarray(b_vec, f32).reshape(1, dz)
    w1 = jnp.asarray(w1, f32)
    w1f = w1 / k.T                                           # (Dz, H)
    b1f = jnp.asarray(b1, f32).reshape(1, hidden) - (b / k) @ w1
    w2f = jnp.asarray(w2, f32)                               # (H, H)
    b2f = jnp.asarray(b2, f32).reshape(1, hidden)
    w3f = jnp.asarray(w3, f32) / k                           # (H, Dz)
    b3f = jnp.asarray(b3, f32).reshape(1, dz) / k            # (1, Dz)
    return w1f, b1f, w2f, b2f, w3f, b3f


# ---------------------------------------------------------------------------
# pallas_call wrapper
# ---------------------------------------------------------------------------
def _score_xux_apply_impl(z, w1f, b1f, w2f, b2f, w3f, b3f, block_batch):
    f32 = jnp.float32
    z = jnp.asarray(z, f32)
    batch, dz = z.shape
    hidden = w1f.shape[1]

    if block_batch is None:
        block_batch, n_steps = _choose_block_batch(batch, _tensorcore_count())
    else:
        assert block_batch % 8 == 0, "block_batch must be a multiple of 8"
        n_steps = _cdiv(batch, block_batch)

    # VMEM envelope: double-buffered (bm, Dz) in/out tiles + two (bm, H) f32
    # activations ~= bm * (4*Dz + 2*H) * 4 bytes  (~3.5 MB at bm=8192) --
    # comfortably under every generation's scoped VMEM default.
    assert block_batch * (4 * dz + 2 * hidden) * 4 < 12 * 1024 * 1024, (
        "block_batch exceeds the conservative VMEM envelope")

    padded = n_steps * block_batch
    if padded != batch:
        # Zero-pad the batch (fused by XLA into the surrounding jit).  Padded
        # output rows are garbage and are sliced off below -- never consume
        # the padded buffer unsliced (e.g. via input_output_aliases).
        z = jnp.pad(z, ((0, padded - batch), (0, 0)))

    const2d = lambda shape: pl.BlockSpec(shape, lambda i: (0, 0))

    out = pl.pallas_call(
        _score_xux_kernel,
        out_shape=jax.ShapeDtypeStruct((padded, dz), f32),
        grid=(n_steps,),
        in_specs=[
            pl.BlockSpec((block_batch, dz), lambda i: (i, 0)),  # z row tile
            const2d((dz, hidden)),       # W1' (normalization folded)
            const2d((1, hidden)),        # b1'
            const2d((hidden, hidden)),   # W2
            const2d((1, hidden)),        # b2
            const2d((hidden, dz)),       # W3' (1/k folded)
            const2d((1, dz)),            # b3'
        ],
        out_specs=pl.BlockSpec((block_batch, dz), lambda i: (i, 0)),
        compiler_params=pltpu.CompilerParams(
            dimension_semantics=("parallel",)),
    )(z, w1f, b1f, w2f, b2f, w3f, b3f)

    if padded != batch:
        out = out[:batch]
    return out


@functools.partial(jax.jit, static_argnames=("block_batch",))
def score_xux_apply(z, w1f, b1f, w2f, b2f, w3f, b3f, *, block_batch=None):
    """Kernel entry point for pre-folded parameters (hoisted folding path)."""
    return _score_xux_apply_impl(z, w1f, b1f, w2f, b2f, w3f, b3f, block_batch)


@functools.partial(jax.jit, static_argnames=("block_batch",))
def score_estimator_xux_forward(z, k_vec, b_vec, w1, b1, w2, b2, w3, b3,
                                *, block_batch=None):
    """Forward pass of ScoreEstimatorXux: returns net((z - b)/k) / k.

    z:            (B, Dz), Dz = dim_x + dim_u + dim_x
    k_vec, b_vec: per-feature normalizer constants (broadcastable to (1, Dz));
                  k_vec = cat(k_x, k_u, k_x/alpha), b_vec = cat(b_x, b_u, b_x)
    w1 (Dz,H), b1 (1,H), w2 (H,H), b2 (1,H), w3 (H,Dz), b3 (1,Dz): MLP params.
    The whole computation (folding, padding, kernel, slice) runs under one jit.
    """
    folded = fold_score_params(k_vec, b_vec, w1, b1, w2, b2, w3, b3)
    return _score_xux_apply_impl(z, *folded, block_batch)


def _reference_forward(z, k_vec, b_vec, w1, b1, w2, b2, w3, b3):
    zbar = (z - b_vec) / k_vec
    h1 = jnp.maximum(zbar @ w1 + b1, 0.0)
    h2 = jnp.maximum(h1 @ w2 + b2, 0.0)
    return (h2 @ w3 + b3) / k_vec


# TODO(synk): evaluate_loss / train_network (optimizer loop, noise sampling)
# are host-side training utilities and are not implemented as kernels.

if __name__ == "__main__":
    # Module hyper-parameters (small, consistent with the forward pass).
    dim_x, dim_u = 4, 2
    dim_z = dim_x + dim_u + dim_x          # 10
    hidden = 32
    batch = 256
    alpha = 2.0

    key = jax.random.PRNGKey(0)
    kz, k1, k2, k3 = jax.random.split(key, 4)

    # Deterministic normalizer parameters (Normalizer: x_bar = (x - b) / k).
    k_x = 1.0 + 0.1 * jnp.arange(dim_x, dtype=jnp.float32)
    b_x = 0.05 * jnp.arange(dim_x, dtype=jnp.float32)
    k_u = 1.5 + 0.1 * jnp.arange(dim_u, dtype=jnp.float32)
    b_u = -0.02 * jnp.arange(dim_u, dtype=jnp.float32)
    k_xnext = k_x / alpha                  # xnext_normalizer.k = x_normalizer.k / alpha
    b_xnext = b_x                          # xnext_normalizer.b = x_normalizer.b

    k_vec = jnp.concatenate([k_x, k_u, k_xnext]).reshape(1, dim_z)
    b_vec = jnp.concatenate([b_x, b_u, b_xnext]).reshape(1, dim_z)

    # Deterministic MLP weights (`network` with dim_in == dim_out == dim_z).
    w1 = 0.1 * jax.random.normal(k1, (dim_z, hidden), dtype=jnp.float32)
    b1 = jnp.zeros((1, hidden), dtype=jnp.float32)
    w2 = 0.1 * jax.random.normal(k2, (hidden, hidden), dtype=jnp.float32)
    b2 = jnp.zeros((1, hidden), dtype=jnp.float32)
    w3 = 0.1 * jax.random.normal(k3, (hidden, dim_z), dtype=jnp.float32)
    b3 = jnp.zeros((1, dim_z), dtype=jnp.float32)

    # Example input z = [x, u, xnext] -- single grid step, no padding.
    z = jax.random.normal(kz, (batch, dim_z), dtype=jnp.float32)
    out = score_estimator_xux_forward(z, k_vec, b_vec, w1, b1, w2, b2, w3, b3)
    out = jax.block_until_ready(out)
    ref = _reference_forward(z, k_vec, b_vec, w1, b1, w2, b2, w3, b3)
    assert out.shape == (batch, dim_z)
    assert jnp.allclose(out, ref, atol=1e-5, rtol=1e-4), \
        float(jnp.max(jnp.abs(out - ref)))

    # Second case: hoisted folding path + non-divisible batch (pad + multi-step grid).
    z2 = jax.random.normal(jax.random.PRNGKey(1), (300, dim_z), dtype=jnp.float32)
    folded = fold_score_params(k_vec, b_vec, w1, b1, w2, b2, w3, b3)
    out2 = score_xux_apply(z2, *folded, block_batch=128)
    out2 = jax.block_until_ready(out2)
    ref2 = _reference_forward(z2, k_vec, b_vec, w1, b1, w2, b2, w3, b3)
    assert out2.shape == (300, dim_z)
    assert jnp.allclose(out2, ref2, atol=1e-5, rtol=1e-4), \
        float(jnp.max(jnp.abs(out2 - ref2)))

    print("KERNEL_OK")
</pallas_src>

<mosaic_0001>
module attributes {stable_mosaic.version = 11 : i64} {
  func.func @_score_xux_kernel(%arg0: i32, %arg1: memref<256x10xf32, #tpu.memory_space<vmem>>, %arg2: memref<10x32xf32, #tpu.memory_space<vmem>>, %arg3: memref<1x32xf32, #tpu.memory_space<vmem>>, %arg4: memref<32x32xf32, #tpu.memory_space<vmem>>, %arg5: memref<1x32xf32, #tpu.memory_space<vmem>>, %arg6: memref<32x10xf32, #tpu.memory_space<vmem>>, %arg7: memref<1x10xf32, #tpu.memory_space<vmem>>, %arg8: memref<256x10xf32, #tpu.memory_space<vmem>>) attributes {dimension_semantics = [#tpu.dimension_semantics<parallel>], iteration_bounds = array<i64: 1>, scalar_prefetch = 0 : i64, scratch_operands = 0 : i64, tpu.core_type = #tpu.core_type<tc>, window_params = [{transform_indices = @transform_0, window_bounds = array<i64: 256, 10>}, {pipeline_mode = #tpu.pipeline_mode<synchronous>, transform_indices = @transform_1, window_bounds = array<i64: 10, 32>}, {pipeline_mode = #tpu.pipeline_mode<synchronous>, transform_indices = @transform_2, window_bounds = array<i64: 1, 32>}, {pipeline_mode = #tpu.pipeline_mode<synchronous>, transform_indices = @transform_3, window_bounds = array<i64: 32, 32>}, {pipeline_mode = #tpu.pipeline_mode<synchronous>, transform_indices = @transform_4, window_bounds = array<i64: 1, 32>}, {pipeline_mode = #tpu.pipeline_mode<synchronous>, transform_indices = @transform_5, window_bounds = array<i64: 32, 10>}, {pipeline_mode = #tpu.pipeline_mode<synchronous>, transform_indices = @transform_6, window_bounds = array<i64: 1, 10>}, {transform_indices = @transform_7, window_bounds = array<i64: 256, 10>}]} {
    %c0 = arith.constant 0 : index
    %c0_0 = arith.constant 0 : index
    %0 = vector.load %arg1[%c0, %c0_0] : memref<256x10xf32, #tpu.memory_space<vmem>>, vector<256x10xf32>
    %c0_1 = arith.constant 0 : index
    %c0_2 = arith.constant 0 : index
    %1 = vector.load %arg2[%c0_1, %c0_2] : memref<10x32xf32, #tpu.memory_space<vmem>>, vector<10x32xf32>
    %cst = arith.constant dense<0.000000e+00> : vector<256x32xf32>
    %2 = tpu.matmul %0, %1, %cst {dimension_numbers = #tpu.dot_dimension_numbers<[1], [0], [0], [1], [0, 0, 1, 1], [], []>} : vector<256x10xf32>, vector<10x32xf32>, vector<256x32xf32> -> vector<256x32xf32>
    %c0_3 = arith.constant 0 : index
    %c0_4 = arith.constant 0 : index
    %3 = vector.load %arg3[%c0_3, %c0_4] : memref<1x32xf32, #tpu.memory_space<vmem>>, vector<1x32xf32>
    %4 = vector.broadcast %3 : vector<1x32xf32> to vector<256x32xf32>
    %5 = arith.addf %2, %4 : vector<256x32xf32>
    %cst_5 = arith.constant 0.000000e+00 : f32
    %6 = vector.broadcast %cst_5 : f32 to vector<256x32xf32>
    %7 = arith.maximumf %5, %6 : vector<256x32xf32>
    %c0_6 = arith.constant 0 : index
    %c0_7 = arith.constant 0 : index
    %8 = vector.load %arg4[%c0_6, %c0_7] : memref<32x32xf32, #tpu.memory_space<vmem>>, vector<32x32xf32>
    %cst_8 = arith.constant dense<0.000000e+00> : vector<256x32xf32>
    %9 = tpu.matmul %7, %8, %cst_8 {dimension_numbers = #tpu.dot_dimension_numbers<[1], [0], [0], [1], [0, 0, 1, 1], [], []>} : vector<256x32xf32>, vector<32x32xf32>, vector<256x32xf32> -> vector<256x32xf32>
    %c0_9 = arith.constant 0 : index
    %c0_10 = arith.constant 0 : index
    %10 = vector.load %arg5[%c0_9, %c0_10] : memref<1x32xf32, #tpu.memory_space<vmem>>, vector<1x32xf32>
    %11 = vector.broadcast %10 : vector<1x32xf32> to vector<256x32xf32>
    %12 = arith.addf %9, %11 : vector<256x32xf32>
    %cst_11 = arith.constant 0.000000e+00 : f32
    %13 = vector.broadcast %cst_11 : f32 to vector<256x32xf32>
    %14 = arith.maximumf %12, %13 : vector<256x32xf32>
    %c0_12 = arith.constant 0 : index
    %c0_13 = arith.constant 0 : index
    %15 = vector.load %arg6[%c0_12, %c0_13] : memref<32x10xf32, #tpu.memory_space<vmem>>, vector<32x10xf32>
    %cst_14 = arith.constant dense<0.000000e+00> : vector<256x10xf32>
    %16 = tpu.matmul %14, %15, %cst_14 {dimension_numbers = #tpu.dot_dimension_numbers<[1], [0], [0], [1], [0, 0, 1, 1], [], []>} : vector<256x32xf32>, vector<32x10xf32>, vector<256x10xf32> -> vector<256x10xf32>
    %c0_15 = arith.constant 0 : index
    %c0_16 = arith.constant 0 : index
    %17 = vector.load %arg7[%c0_15, %c0_16] : memref<1x10xf32, #tpu.memory_space<vmem>>, vector<1x10xf32>
    %18 = vector.broadcast %17 : vector<1x10xf32> to vector<256x10xf32>
    %19 = arith.addf %16, %18 : vector<256x10xf32>
    %c0_17 = arith.constant 0 : index
    %c0_18 = arith.constant 0 : index
    %20 = vector.load %arg8[%c0_17, %c0_18] : memref<256x10xf32, #tpu.memory_space<vmem>>, vector<256x10xf32>
    tpu.vector_store %arg8[%c0_17, %c0_18], %19 {strides = array<i32>} : memref<256x10xf32, #tpu.memory_space<vmem>>, vector<256x10xf32>,
    return
  }
  func.func @transform_0(%arg0: i32) -> (i32, i32) {
    %c0_i32 = arith.constant 0 : i32
    %c0_i32_0 = arith.constant 0 : i32
    return %arg0, %c0_i32 : i32, i32
  }
  func.func @transform_1(%arg0: i32) -> (i32, i32) {
    %c0_i32 = arith.constant 0 : i32
    %c0_i32_0 = arith.constant 0 : i32
    %c0_i32_1 = arith.constant 0 : i32
    return %c0_i32, %c0_i32_0 : i32, i32
  }
  func.func @transform_2(%arg0: i32) -> (i32, i32) {
    %c0_i32 = arith.constant 0 : i32
    %c0_i32_0 = arith.constant 0 : i32
    %c0_i32_1 = arith.constant 0 : i32
    return %c0_i32, %c0_i32_0 : i32, i32
  }
  func.func @transform_3(%arg0: i32) -> (i32, i32) {
    %c0_i32 = arith.constant 0 : i32
    %c0_i32_0 = arith.constant 0 : i32
    %c0_i32_1 = arith.constant 0 : i32
    return %c0_i32, %c0_i32_0 : i32, i32
  }
  func.func @transform_4(%arg0: i32) -> (i32, i32) {
    %c0_i32 = arith.constant 0 : i32
    %c0_i32_0 = arith.constant 0 : i32
    %c0_i32_1 = arith.constant 0 : i32
    return %c0_i32, %c0_i32_0 : i32, i32
  }
  func.func @transform_5(%arg0: i32) -> (i32, i32) {
    %c0_i32 = arith.constant 0 : i32
    %c0_i32_0 = arith.constant 0 : i32
    %c0_i32_1 = arith.constant 0 : i32
    return %c0_i32, %c0_i32_0 : i32, i32
  }
  func.func @transform_6(%arg0: i32) -> (i32, i32) {
    %c0_i32 = arith.constant 0 : i32
    %c0_i32_0 = arith.constant 0 : i32
    %c0_i32_1 = arith.constant 0 : i32
    return %c0_i32, %c0_i32_0 : i32, i32
  }
  func.func @transform_7(%arg0: i32) -> (i32, i32) {
    %c0_i32 = arith.constant 0 : i32
    %c0_i32_0 = arith.constant 0 : i32
    return %arg0, %c0_i32 : i32, i32
  }
}

</mosaic_0001>

<bundles_post_ra>
// kernel: score_estimator_xux_forward.1
= control target key start
LH: loop header
LB: loop body
LE: loop exit
PB: predicated region body
PF: predicated region fallthrough
CT: control target
= control target key end

     0   :  { %vm161_vm0 = vcmask 1041408   ;;  %vm64_vm1 = vcmask 80896   ;;  %vm318_vm2 = vcmask 261120   ;;  %s1424_s1 = inlined_call_operand.vmem [shape: f32[10,32], index: 1, kind: input, shape index: {}]   ;;  %s1425_s0 = inlined_call_operand.vmem [shape: f32[256,10], index: 0, kind: input, shape index: {}]   ;;  %s1426_s2 = inlined_call_operand.vmem [shape: f32[1,32], index: 2, kind: input, shape index: {}]   ;;  %s1427_s3 = inlined_call_operand.vmem [shape: f32[32,32], index: 3, kind: input, shape index: {}]   ;;  %s1428_s4 = inlined_call_operand.vmem [shape: f32[1,32], index: 4, kind: input, shape index: {}]   ;;  %s1429_s5 = inlined_call_operand.vmem [shape: f32[32,10], index: 5, kind: input, shape index: {}]   ;;  %s1430_s6 = inlined_call_operand.vmem [shape: f32[1,10], index: 6, kind: input, shape index: {}]   ;;  %s1431_s7 = inlined_call_operand.vmem [shape: f32[256,10], index: 7, kind: output, shape index: {}]  }
   0x1   :  { %v59_v0 = vld [vmem:[%s1424_s1 + $0x8] sm:$0x3]  ;;  %v58_v1 = vld [vmem:[%s1424_s1] sm:$0xff]  ;;  %v28_v4 = vld [vmem:[%s1425_s0 + $0x10] sm:$0xff] }
   0x2   :  { %813 = vmatpush.msk.msra.mxu0 %vm161_vm0, %v59_v0  ;;  %v26_v2 = vld [vmem:[%s1425_s0] sm:$0xff]  ;;  %910 = vmatpush.msk.msra.mxu3 %vm161_vm0, %v59_v0  ;;  %v27_v3 = vld [vmem:[%s1425_s0 + $0x8] sm:$0xff]  ;;  %v29_v5 = vld [vmem:[%s1425_s0 + $0x18] sm:$0xff] }
   0x3   :  { %v30_v6 = vld [vmem:[%s1425_s0 + $0x20] sm:$0xff]  ;;  %v31_v7 = vld [vmem:[%s1425_s0 + $0x28] sm:$0xff]  ;;  %v32_v8 = vld [vmem:[%s1425_s0 + $0x30] sm:$0xff] }
   0x4   :  { %180 = vmatpush.msra.mxu0 %v58_v1  ;;  %911 = vmatpush.msra.mxu3 %v58_v1  ;;  %v33_v9 = vld [vmem:[%s1425_s0 + $0x38] sm:$0xff]  ;;  %v34_v10 = vld [vmem:[%s1425_s0 + $0x40] sm:$0xff]  ;;  %v35_v11 = vld [vmem:[%s1425_s0 + $0x48] sm:$0xff] }
   0x5   :  { %814 = vmatmul.msk.f32.vlgmr.msra.gmra.mxu0 %vm64_vm1, %v26_v2  ;;  %v36_v12 = vld [vmem:[%s1425_s0 + $0x50] sm:$0xff]  ;;  %v37_v13 = vld [vmem:[%s1425_s0 + $0x58] sm:$0xff]  ;;  %v38_v16 = vld [vmem:[%s1425_s0 + $0x60] sm:$0xff] }
   0x6   :  { %v313_v14 = vld [vmem:[%s1427_s3 + $0x18] sm:$0xff]  ;;  %v312_v15 = vld [vmem:[%s1427_s3 + $0x10] sm:$0xff]  ;;  %v311_v17 = vld [vmem:[%s1427_s3 + $0x8] sm:$0xff] }
   0x7   :  { %427 = vmatpush.msra.mxu1 %v313_v14  ;;  %912 = vmatpush.msrb.mxu3 %v313_v14  ;;  %v310_v18 = vld [vmem:[%s1427_s3] sm:$0xff]  ;;  %v39_v19 = vld [vmem:[%s1425_s0 + $0x68] sm:$0xff]  ;;  %v40_v20 = vld [vmem:[%s1425_s0 + $0x70] sm:$0xff] }
   0x8   :  { %v41_v21 = vld [vmem:[%s1425_s0 + $0x78] sm:$0xff]  ;;  %v1048_v22 = vld [vmem:[%s1426_s2] ss:$0 sm:$0xff]  ;;  %v43_v28 = vld [vmem:[%s1425_s0 + $0x88] sm:$0xff] }
   0x9   :  { %428 = vmatpush.msra.mxu1 %v312_v15  ;;  %913 = vmatpush.msrb.mxu3 %v312_v15  ;;  %v42_v24 = vld [vmem:[%s1425_s0 + $0x80] sm:$0xff]  ;;  %v44_v32 = vld [vmem:[%s1425_s0 + $0x90] sm:$0xff]  ;;  %v45_v36 = vld [vmem:[%s1425_s0 + $0x98] sm:$0xff] }
   0xa   :  { %v46_v40 = vld [vmem:[%s1425_s0 + $0xa0] sm:$0xff]  ;;  %v51_v43 = vld [vmem:[%s1425_s0 + $0xc8] sm:$0xff]  ;;  %v52_v48 = vld [vmem:[%s1425_s0 + $0xd0] sm:$0xff] }
   0xb   :  { %429 = vmatpush.msra.mxu1 %v311_v17  ;;  %914 = vmatpush.msrb.mxu3 %v311_v17  ;;  %v47_v45 = vld [vmem:[%s1425_s0 + $0xa8] sm:$0xff]  ;;  %v48_v50 = vld [vmem:[%s1425_s0 + $0xb0] sm:$0xff]  ;;  %v53_v53 = vld [vmem:[%s1425_s0 + $0xd8] sm:$0xff] }
   0xc   :  { %839 = vmatmul.msk.f32.vlgmr.msra.gmra.mxu3 %vm64_vm1, %v51_v43  ;;  %v49_v55 = vld [vmem:[%s1425_s0 + $0xb8] sm:$0xff]  ;;  %v54_v58 = vld [vmem:[%s1425_s0 + $0xe0] sm:$0xff]  ;;  %v55_v63 = vld [vmem:[%s1425_s0 + $0xe8] sm:$0xff] }
   0xd   :  { %815 = vmatmul.msk.f32.gmra.mxu0 %vm64_vm1, %v27_v3  ;;  %430 = vmatpush.msra.mxu1 %v310_v18  ;;  %v50_v60 = vld [vmem:[%s1425_s0 + $0xc0] sm:$0xff]  ;;  %v56_v3 = vld [vmem:[%s1425_s0 + $0xf0] sm:$0xff] }
   0xe   :  { %915 = vmatpush.msrb.mxu3 %v310_v18  ;;  %v562_v14 = vld [vmem:[%s1429_s5 + $0x10] sm:$0xff]  ;;  %v560_v17 = vld [vmem:[%s1429_s5] sm:$0xff] }
  0x14   :  { %840 = vmatmul.msk.f32.gmra.mxu3 %vm64_vm1, %v52_v48 }
  0x15   :  { %816 = vmatmul.msk.f32.gmra.mxu0 %vm64_vm1, %v28_v4 }
  0x1c   :  { %841 = vmatmul.msk.f32.gmra.mxu3 %vm64_vm1, %v53_v53 }
  0x1d   :  { %817 = vmatmul.msk.f32.gmra.mxu0 %vm64_vm1, %v29_v5 }
  0x24   :  { %842 = vmatmul.msk.f32.gmra.mxu3 %vm64_vm1, %v54_v58 }
  0x25   :  { %818 = vmatmul.msk.f32.gmra.mxu0 %vm64_vm1, %v30_v6 }
  0x2c   :  { %843 = vmatmul.msk.f32.gmra.mxu3 %vm64_vm1, %v55_v63 }
  0x2d   :  { %819 = vmatmul.msk.f32.gmra.mxu0 %vm64_vm1, %v31_v7  ;;  %v57_v7 = vld [vmem:[%s1425_s0 + $0xf8] sm:$0xff] }
  0x34   :  { %844 = vmatmul.msk.f32.gmra.mxu3 %vm64_vm1, %v56_v3 }
  0x35   :  { %820 = vmatmul.msk.f32.gmra.mxu0 %vm64_vm1, %v32_v8 }
  0x3c   :  { %845 = vmatmul.msk.f32.gmra.mxu3 %vm64_vm1, %v57_v7 }
  0x3d   :  { %821 = vmatmul.msk.f32.gmra.mxu0 %vm64_vm1, %v33_v9 }
  0x45   :  { %822 = vmatmul.msk.f32.gmra.mxu0 %vm64_vm1, %v34_v10 }
  0x4d   :  { %823 = vmatmul.msk.f32.gmra.mxu0 %vm64_vm1, %v35_v11  ;;  %v563_v11 = vld [vmem:[%s1429_s5 + $0x18] sm:$0xff] }
  0x4e   :  { %676 = vmatpush.msra.mxu2 %v563_v11  ;;  %916 = vmatpush.msra.mxu3 %v563_v11 }
  0x50   :  { %677 = vmatpush.msra.mxu2 %v562_v14  ;;  %917 = vmatpush.msra.mxu3 %v562_v14 }
  0x55   :  { %824 = vmatmul.msk.f32.gmra.mxu0 %vm64_vm1, %v36_v12 }
  0x5d   :  { %825 = vmatmul.msk.f32.gmra.mxu0 %vm64_vm1, %v37_v13 }
  0x65   :  { %826 = vmatmul.msk.f32.gmra.mxu0 %vm64_vm1, %v38_v16  ;;  %v561_v16 = vld [vmem:[%s1429_s5 + $0x8] sm:$0xff] }
  0x66   :  { %678 = vmatpush.msra.mxu2 %v561_v16  ;;  %918 = vmatpush.msra.mxu3 %v561_v16 }
  0x68   :  { %679 = vmatpush.msra.mxu2 %v560_v17  ;;  %919 = vmatpush.msra.mxu3 %v560_v17 }
  0x6d   :  { %827 = vmatmul.msk.f32.gmra.mxu0 %vm64_vm1, %v39_v19 }
  0x75   :  { %828 = vmatmul.msk.f32.gmra.mxu0 %vm64_vm1, %v40_v20 }
  0x7d   :  { %829 = vmatmul.msk.f32.gmra.mxu0 %vm64_vm1, %v41_v21 }
  0x82   :  { %v182_v23 = vpop.f32.mrf.mxu0 }
  0x83   :  { %v183_v25 = vadd.f32 %v1048_v22, %v182_v23 }
  0x85   :  { %v278_v26 = vmax.f32 %v183_v25, 0.0  ;;  %830 = vmatmul.msk.f32.gmra.mxu0 %vm64_vm1, %v42_v24 }
  0x87   :  { %846 = vmatmul.msk.f32.vlgmr.msra.gmra.mxu1 %vm318_vm2, %v278_v26 }
  0x8a   :  { %v185_v27 = vpop.f32.mrf.mxu0 }
  0x8b   :  { %v186_v29 = vadd.f32 %v1048_v22, %v185_v27 }
  0x8d   :  { %v279_v30 = vmax.f32 %v186_v29, 0.0  ;;  %831 = vmatmul.msk.f32.gmra.mxu0 %vm64_vm1, %v43_v28  ;;  %v1161_v28 = vld [vmem:[%s1428_s4] ss:$0 sm:$0xff] }
  0x8f   :  { %847 = vmatmul.msk.f32.gmra.mxu1 %vm318_vm2, %v279_v30  ;;  %v257_v7 = vpop.f32.mrf.mxu3 }
  0x92   :  { %v188_v31 = vpop.f32.mrf.mxu0 }
  0x93   :  { %v189_v33 = vadd.f32 %v1048_v22, %v188_v31 }
  0x95   :  { %v280_v34 = vmax.f32 %v189_v33, 0.0  ;;  %832 = vmatmul.msk.f32.gmra.mxu0 %vm64_vm1, %v44_v32 }
  0x97   :  { %848 = vmatmul.msk.f32.gmra.mxu1 %vm318_vm2, %v280_v34 }
  0x9a   :  { %v191_v35 = vpop.f32.mrf.mxu0 }
  0x9b   :  { %v192_v37 = vadd.f32 %v1048_v22, %v191_v35 }
  0x9d   :  { %v281_v38 = vmax.f32 %v192_v37, 0.0  ;;  %833 = vmatmul.msk.f32.gmra.mxu0 %vm64_vm1, %v45_v36 }
  0x9f   :  { %849 = vmatmul.msk.f32.gmra.mxu1 %vm318_vm2, %v281_v38 }
  0xa2   :  { %v194_v39 = vpop.f32.mrf.mxu0 }
  0xa3   :  { %v195_v41 = vadd.f32 %v1048_v22, %v194_v39 }
  0xa5   :  { %v282_v42 = vmax.f32 %v195_v41, 0.0  ;;  %834 = vmatmul.msk.f32.gmra.mxu0 %vm64_vm1, %v46_v40 }
  0xa7   :  { %850 = vmatmul.msk.f32.gmra.mxu1 %vm318_vm2, %v282_v42 }
  0xaa   :  { %v197_v44 = vpop.f32.mrf.mxu0 }
  0xab   :  { %v198_v46 = vadd.f32 %v1048_v22, %v197_v44 }
  0xad   :  { %v283_v47 = vmax.f32 %v198_v46, 0.0  ;;  %835 = vmatmul.msk.f32.gmra.mxu0 %vm64_vm1, %v47_v45 }
  0xaf   :  { %851 = vmatmul.msk.f32.gmra.mxu1 %vm318_vm2, %v283_v47 }
  0xb2   :  { %v200_v49 = vpop.f32.mrf.mxu0 }
  0xb3   :  { %v201_v51 = vadd.f32 %v1048_v22, %v200_v49 }
  0xb5   :  { %v284_v52 = vmax.f32 %v201_v51, 0.0  ;;  %836 = vmatmul.msk.f32.gmra.mxu0 %vm64_vm1, %v48_v50 }
  0xb7   :  { %852 = vmatmul.msk.f32.gmra.mxu1 %vm318_vm2, %v284_v52 }
  0xba   :  { %v203_v54 = vpop.f32.mrf.mxu0 }
  0xbb   :  { %v204_v56 = vadd.f32 %v1048_v22, %v203_v54 }
  0xbd   :  { %v285_v57 = vmax.f32 %v204_v56, 0.0  ;;  %837 = vmatmul.msk.f32.gmra.mxu0 %vm64_vm1, %v49_v55 }
  0xbf   :  { %853 = vmatmul.msk.f32.gmra.mxu1 %vm318_vm2, %v285_v57 }
  0xc2   :  { %v206_v59 = vpop.f32.mrf.mxu0 }
  0xc3   :  { %v207_v61 = vadd.f32 %v1048_v22, %v206_v59 }
  0xc5   :  { %v286_v62 = vmax.f32 %v207_v61, 0.0  ;;  %838 = vmatmul.msk.f32.gmra.mxu0 %vm64_vm1, %v50_v60 }
  0xc7   :  { %854 = vmatmul.msk.f32.gmra.mxu1 %vm318_vm2, %v286_v62 }
  0xca   :  { %v209_v0 = vpop.f32.mrf.mxu0 }
  0xcb   :  { %v210_v1 = vadd.f32 %v1048_v22, %v209_v0 }
  0xcd   :  { %v287_v2 = vmax.f32 %v210_v1, 0.0 }
  0xcf   :  { %855 = vmatmul.msk.f32.gmra.mxu1 %vm318_vm2, %v287_v2 }
  0xd2   :  { %v212_v4 = vpop.f32.mrf.mxu0 }
  0xd3   :  { %v213_v5 = vadd.f32 %v1048_v22, %v212_v4 }
  0xd5   :  { %v288_v6 = vmax.f32 %v213_v5, 0.0 }
  0xd7   :  { %856 = vmatmul.msk.f32.gmra.mxu1 %vm318_vm2, %v288_v6 }
  0xda   :  { %v215_v8 = vpop.f32.mrf.mxu0 }
  0xdb   :  { %v216_v9 = vadd.f32 %v1048_v22, %v215_v8 }
  0xdd   :  { %v289_v10 = vmax.f32 %v216_v9, 0.0 }
  0xdf   :  { %857 = vmatmul.msk.f32.gmra.mxu1 %vm318_vm2, %v289_v10 }
  0xe2   :  { %v218_v12 = vpop.f32.mrf.mxu0 }
  0xe3   :  { %v219_v13 = vadd.f32 %v1048_v22, %v218_v12 }
  0xe5   :  { %v290_v15 = vmax.f32 %v219_v13, 0.0 }
  0xe7   :  { %858 = vmatmul.msk.f32.gmra.mxu1 %vm318_vm2, %v290_v15  ;;  %v260_v15 = vpop.f32.mrf.mxu3 }
  0xea   :  { %v221_v18 = vpop.f32.mrf.mxu0 }
  0xeb   :  { %v222_v19 = vadd.f32 %v1048_v22, %v221_v18 }
  0xed   :  { %v291_v20 = vmax.f32 %v222_v19, 0.0 }
  0xef   :  { %859 = vmatmul.msk.f32.gmra.mxu1 %vm318_vm2, %v291_v20 }
  0xf2   :  { %v224_v21 = vpop.f32.mrf.mxu0 }
  0xf3   :  { %v225_v23 = vadd.f32 %v1048_v22, %v224_v21  ;;  %v258_v21 = vadd.f32 %v1048_v22, %v257_v7 }
  0xf5   :  { %v292_v24 = vmax.f32 %v225_v23, 0.0  ;;  %v303_v23 = vmax.f32 %v258_v21, 0.0 }
  0xf7   :  { %860 = vmatmul.msk.f32.gmra.mxu1 %vm318_vm2, %v292_v24 }
  0xfa   :  { %v227_v25 = vpop.f32.mrf.mxu0 }
  0xfb   :  { %v228_v26 = vadd.f32 %v1048_v22, %v227_v25  ;;  %v263_v25 = vpop.f32.mrf.mxu3 }
  0xfd   :  { %v293_v27 = vmax.f32 %v228_v26, 0.0 }
  0xff   :  { %861 = vmatmul.msk.f32.gmra.mxu1 %vm318_vm2, %v293_v27 }
 0x102   :  { %v230_v29 = vpop.f32.mrf.mxu0 }
 0x103   :  { %v231_v30 = vadd.f32 %v1048_v22, %v230_v29  ;;  %v261_v29 = vadd.f32 %v1048_v22, %v260_v15 }
 0x104   :  { %v432_v31 = vpop.f32.mrf.mxu1 }
 0x105   :  { %v294_v32 = vmax.f32 %v231_v30, 0.0  ;;  %v433_v33 = vadd.f32 %v1161_v28, %v432_v31  ;;  %v304_v30 = vmax.f32 %v261_v29, 0.0 }
 0x107   :  { %v528_v34 = vmax.f32 %v433_v33, 0.0  ;;  %862 = vmatmul.msk.f32.gmra.mxu1 %vm318_vm2, %v294_v32  ;;  %v266_v33 = vpop.f32.mrf.mxu3 }
 0x109   :  { %878 = vmatmul.msk.f32.vlgmr.msra.gmra.mxu2 %vm318_vm2, %v528_v34 }
 0x10a   :  { %v233_v35 = vpop.f32.mrf.mxu0 }
 0x10b   :  { %v234_v36 = vadd.f32 %v1048_v22, %v233_v35  ;;  %v264_v35 = vadd.f32 %v1048_v22, %v263_v25 }
 0x10c   :  { %v435_v37 = vpop.f32.mrf.mxu1 }
 0x10d   :  { %v295_v38 = vmax.f32 %v234_v36, 0.0  ;;  %v436_v39 = vadd.f32 %v1161_v28, %v435_v37  ;;  %v305_v36 = vmax.f32 %v264_v35, 0.0 }
 0x10f   :  { %v529_v40 = vmax.f32 %v436_v39, 0.0  ;;  %863 = vmatmul.msk.f32.gmra.mxu1 %vm318_vm2, %v295_v38 }
 0x111   :  { %879 = vmatmul.msk.f32.gmra.mxu2 %vm318_vm2, %v529_v40  ;;  %v267_v40 = vadd.f32 %v1048_v22, %v266_v33 }
 0x112   :  { %v236_v41 = vpop.f32.mrf.mxu0 }
 0x113   :  { %v237_v42 = vadd.f32 %v1048_v22, %v236_v41  ;;  %v269_v41 = vpop.f32.mrf.mxu3 }
 0x114   :  { %v438_v43 = vpop.f32.mrf.mxu1 }
 0x115   :  { %v296_v44 = vmax.f32 %v237_v42, 0.0  ;;  %v439_v45 = vadd.f32 %v1161_v28, %v438_v43  ;;  %v306_v42 = vmax.f32 %v267_v40, 0.0 }
 0x117   :  { %v530_v46 = vmax.f32 %v439_v45, 0.0  ;;  %864 = vmatmul.msk.f32.gmra.mxu1 %vm318_vm2, %v296_v44 }
 0x119   :  { %880 = vmatmul.msk.f32.gmra.mxu2 %vm318_vm2, %v530_v46  ;;  %v270_v46 = vadd.f32 %v1048_v22, %v269_v41 }
 0x11a   :  { %v239_v47 = vpop.f32.mrf.mxu0 }
 0x11b   :  { %v240_v48 = vadd.f32 %v1048_v22, %v239_v47  ;;  %v272_v47 = vpop.f32.mrf.mxu3 }
 0x11c   :  { %v441_v49 = vpop.f32.mrf.mxu1 }
 0x11d   :  { %v297_v50 = vmax.f32 %v240_v48, 0.0  ;;  %v442_v51 = vadd.f32 %v1161_v28, %v441_v49  ;;  %v307_v48 = vmax.f32 %v270_v46, 0.0 }
 0x11f   :  { %v531_v52 = vmax.f32 %v442_v51, 0.0  ;;  %865 = vmatmul.msk.f32.gmra.mxu1 %vm318_vm2, %v297_v50 }
 0x121   :  { %881 = vmatmul.msk.f32.gmra.mxu2 %vm318_vm2, %v531_v52  ;;  %v273_v52 = vadd.f32 %v1048_v22, %v272_v47 }
 0x122   :  { %v242_v53 = vpop.f32.mrf.mxu0 }
 0x123   :  { %v243_v54 = vadd.f32 %v1048_v22, %v242_v53  ;;  %v308_v53 = vmax.f32 %v273_v52, 0.0 }
 0x124   :  { %v444_v55 = vpop.f32.mrf.mxu1 }
 0x125   :  { %v298_v56 = vmax.f32 %v243_v54, 0.0  ;;  %v445_v57 = vadd.f32 %v1161_v28, %v444_v55  ;;  %v275_v55 = vpop.f32.mrf.mxu3 }
 0x127   :  { %v532_v58 = vmax.f32 %v445_v57, 0.0  ;;  %866 = vmatmul.msk.f32.gmra.mxu1 %vm318_vm2, %v298_v56 }
 0x129   :  { %882 = vmatmul.msk.f32.gmra.mxu2 %vm318_vm2, %v532_v58  ;;  %v276_v58 = vadd.f32 %v1048_v22, %v275_v55 }
 0x12a   :  { %v245_v59 = vpop.f32.mrf.mxu0 }
 0x12b   :  { %v246_v60 = vadd.f32 %v1048_v22, %v245_v59  ;;  %v309_v59 = vmax.f32 %v276_v58, 0.0 }
 0x12c   :  { %v447_v61 = vpop.f32.mrf.mxu1 }
 0x12d   :  { %v299_v62 = vmax.f32 %v246_v60, 0.0  ;;  %v448_v63 = vadd.f32 %v1161_v28, %v447_v61 }
 0x12f   :  { %v533_v0 = vmax.f32 %v448_v63, 0.0  ;;  %867 = vmatmul.msk.f32.gmra.mxu1 %vm318_vm2, %v299_v62 }
 0x131   :  { %883 = vmatmul.msk.f32.gmra.mxu2 %vm318_vm2, %v533_v0 }
 0x132   :  { %v248_v1 = vpop.f32.mrf.mxu0 }
 0x133   :  { %v249_v2 = vadd.f32 %v1048_v22, %v248_v1 }
 0x134   :  { %v450_v3 = vpop.f32.mrf.mxu1 }
 0x135   :  { %v300_v4 = vmax.f32 %v249_v2, 0.0  ;;  %v451_v5 = vadd.f32 %v1161_v28, %v450_v3 }
 0x137   :  { %v534_v6 = vmax.f32 %v451_v5, 0.0  ;;  %868 = vmatmul.msk.f32.gmra.mxu1 %vm318_vm2, %v300_v4 }
 0x139   :  { %884 = vmatmul.msk.f32.gmra.mxu2 %vm318_vm2, %v534_v6 }
 0x13a   :  { %v251_v8 = vpop.f32.mrf.mxu0 }
 0x13b   :  { %v252_v9 = vadd.f32 %v1048_v22, %v251_v8 }
 0x13c   :  { %v453_v10 = vpop.f32.mrf.mxu1 }
 0x13d   :  { %v301_v11 = vmax.f32 %v252_v9, 0.0  ;;  %v454_v12 = vadd.f32 %v1161_v28, %v453_v10 }
 0x13f   :  { %v535_v13 = vmax.f32 %v454_v12, 0.0  ;;  %869 = vmatmul.msk.f32.gmra.mxu1 %vm318_vm2, %v301_v11 }
 0x141   :  { %885 = vmatmul.msk.f32.gmra.mxu2 %vm318_vm2, %v535_v13 }
 0x142   :  { %v254_v14 = vpop.f32.mrf.mxu0 }
 0x143   :  { %v255_v16 = vadd.f32 %v1048_v22, %v254_v14  ;;  %v1232_v22 = vld [vmem:[%s1430_s6] ss:$0 sm:$0xff] }
 0x144   :  { %v456_v17 = vpop.f32.mrf.mxu1 }
 0x145   :  { %v302_v18 = vmax.f32 %v255_v16, 0.0  ;;  %v457_v19 = vadd.f32 %v1161_v28, %v456_v17 }
 0x147   :  { %v536_v20 = vmax.f32 %v457_v19, 0.0  ;;  %870 = vmatmul.msk.f32.vlgmr.msrb.gmra.mxu3 %vm318_vm2, %v302_v18 }
 0x149   :  { %886 = vmatmul.msk.f32.gmra.mxu2 %vm318_vm2, %v536_v20 }
 0x14c   :  { %v459_v24 = vpop.f32.mrf.mxu1 }
 0x14d   :  { %v460_v26 = vadd.f32 %v1161_v28, %v459_v24 }
 0x14f   :  { %v537_v27 = vmax.f32 %v460_v26, 0.0  ;;  %871 = vmatmul.msk.f32.gmra.mxu3 %vm318_vm2, %v303_v23 }
 0x151   :  { %887 = vmatmul.msk.f32.gmra.mxu2 %vm318_vm2, %v537_v27 }
 0x154   :  { %v462_v31 = vpop.f32.mrf.mxu1 }
 0x155   :  { %v463_v32 = vadd.f32 %v1161_v28, %v462_v31 }
 0x157   :  { %v538_v34 = vmax.f32 %v463_v32, 0.0  ;;  %872 = vmatmul.msk.f32.gmra.mxu3 %vm318_vm2, %v304_v30 }
 0x159   :  { %888 = vmatmul.msk.f32.gmra.mxu2 %vm318_vm2, %v538_v34 }
 0x15c   :  { %v465_v37 = vpop.f32.mrf.mxu1 }
 0x15d   :  { %v466_v38 = vadd.f32 %v1161_v28, %v465_v37 }
 0x15f   :  { %v539_v39 = vmax.f32 %v466_v38, 0.0  ;;  %873 = vmatmul.msk.f32.gmra.mxu3 %vm318_vm2, %v305_v36 }
 0x161   :  { %889 = vmatmul.msk.f32.gmra.mxu2 %vm318_vm2, %v539_v39 }
 0x164   :  { %v468_v43 = vpop.f32.mrf.mxu1 }
 0x165   :  { %v469_v44 = vadd.f32 %v1161_v28, %v468_v43 }
 0x167   :  { %v540_v45 = vmax.f32 %v469_v44, 0.0  ;;  %874 = vmatmul.msk.f32.gmra.mxu3 %vm318_vm2, %v306_v42 }
 0x169   :  { %890 = vmatmul.msk.f32.gmra.mxu2 %vm318_vm2, %v540_v45 }
 0x16c   :  { %v471_v49 = vpop.f32.mrf.mxu1 }
 0x16d   :  { %v472_v50 = vadd.f32 %v1161_v28, %v471_v49 }
 0x16f   :  { %v541_v51 = vmax.f32 %v472_v50, 0.0  ;;  %875 = vmatmul.msk.f32.gmra.mxu3 %vm318_vm2, %v307_v48 }
 0x171   :  { %891 = vmatmul.msk.f32.gmra.mxu2 %vm318_vm2, %v541_v51 }
 0x174   :  { %v474_v54 = vpop.f32.mrf.mxu1 }
 0x175   :  { %v475_v56 = vadd.f32 %v1161_v28, %v474_v54 }
 0x177   :  { %v542_v57 = vmax.f32 %v475_v56, 0.0  ;;  %876 = vmatmul.msk.f32.gmra.mxu3 %vm318_vm2, %v308_v53 }
 0x179   :  { %892 = vmatmul.msk.f32.gmra.mxu2 %vm318_vm2, %v542_v57 }
 0x17c   :  { %v477_v60 = vpop.f32.mrf.mxu1 }
 0x17d   :  { %v478_v61 = vadd.f32 %v1161_v28, %v477_v60 }
 0x17f   :  { %v543_v62 = vmax.f32 %v478_v61, 0.0  ;;  %877 = vmatmul.msk.f32.gmra.mxu3 %vm318_vm2, %v309_v59 }
 0x181   :  { %893 = vmatmul.msk.f32.gmra.mxu2 %vm318_vm2, %v543_v62 }
 0x184   :  { %v480_v63 = vpop.f32.mrf.mxu1 }
 0x185   :  { %v481_v0 = vadd.f32 %v1161_v28, %v480_v63 }
 0x187   :  { %v544_v1 = vmax.f32 %v481_v0, 0.0 }
 0x189   :  { %894 = vmatmul.msk.f32.gmra.mxu2 %vm318_vm2, %v544_v1 }
 0x18c   :  { %v483_v2 = vpop.f32.mrf.mxu1  ;;  %v681_v3 = vpop.f32.mrf.mxu2 }
 0x18d   :  { %v484_v4 = vadd.f32 %v1161_v28, %v483_v2  ;;  %v682_v5 = vadd.f32 %v1232_v22, %v681_v3 }
 0x18f   :  { %v545_v6 = vmax.f32 %v484_v4, 0.0  ;;  %777 = vst.msk [vmem:[%s1431_s7] sm:$0xff] %vm64_vm1, %v682_v5 }
 0x191   :  { %895 = vmatmul.msk.f32.gmra.mxu2 %vm318_vm2, %v545_v6 }
 0x194   :  { %v486_v7 = vpop.f32.mrf.mxu1  ;;  %v684_v8 = vpop.f32.mrf.mxu2 }
 0x195   :  { %v487_v9 = vadd.f32 %v1161_v28, %v486_v7  ;;  %v685_v10 = vadd.f32 %v1232_v22, %v684_v8 }
 0x197   :  { %v546_v11 = vmax.f32 %v487_v9, 0.0  ;;  %778 = vst.msk [vmem:[%s1431_s7 + $0x8] sm:$0xff] %vm64_vm1, %v685_v10 }
 0x199   :  { %896 = vmatmul.msk.f32.gmra.mxu2 %vm318_vm2, %v546_v11 }
 0x19c   :  { %v489_v12 = vpop.f32.mrf.mxu1  ;;  %v687_v13 = vpop.f32.mrf.mxu2 }
 0x19d   :  { %v490_v14 = vadd.f32 %v1161_v28, %v489_v12  ;;  %v688_v15 = vadd.f32 %v1232_v22, %v687_v13 }
 0x19f   :  { %v547_v16 = vmax.f32 %v490_v14, 0.0  ;;  %779 = vst.msk [vmem:[%s1431_s7 + $0x10] sm:$0xff] %vm64_vm1, %v688_v15 }
 0x1a1   :  { %897 = vmatmul.msk.f32.gmra.mxu2 %vm318_vm2, %v547_v16 }
 0x1a4   :  { %v492_v17 = vpop.f32.mrf.mxu1  ;;  %v690_v18 = vpop.f32.mrf.mxu2 }
 0x1a5   :  { %v493_v19 = vadd.f32 %v1161_v28, %v492_v17  ;;  %v691_v20 = vadd.f32 %v1232_v22, %v690_v18 }
 0x1a7   :  { %v548_v21 = vmax.f32 %v493_v19, 0.0  ;;  %780 = vst.msk [vmem:[%s1431_s7 + $0x18] sm:$0xff] %vm64_vm1, %v691_v20 }
 0x1a9   :  { %898 = vmatmul.msk.f32.gmra.mxu2 %vm318_vm2, %v548_v21 }
 0x1ac   :  { %v495_v23 = vpop.f32.mrf.mxu1  ;;  %v693_v24 = vpop.f32.mrf.mxu2 }
 0x1ad   :  { %v496_v25 = vadd.f32 %v1161_v28, %v495_v23  ;;  %v694_v26 = vadd.f32 %v1232_v22, %v693_v24 }
 0x1af   :  { %v549_v27 = vmax.f32 %v496_v25, 0.0  ;;  %781 = vst.msk [vmem:[%s1431_s7 + $0x20] sm:$0xff] %vm64_vm1, %v694_v26 }
 0x1b1   :  { %899 = vmatmul.msk.f32.gmra.mxu2 %vm318_vm2, %v549_v27 }
 0x1b4   :  { %v498_v29 = vpop.f32.mrf.mxu1  ;;  %v696_v30 = vpop.f32.mrf.mxu2 }
 0x1b5   :  { %v499_v31 = vadd.f32 %v1161_v28, %v498_v29  ;;  %v697_v32 = vadd.f32 %v1232_v22, %v696_v30 }
 0x1b7   :  { %v550_v33 = vmax.f32 %v499_v31, 0.0  ;;  %782 = vst.msk [vmem:[%s1431_s7 + $0x28] sm:$0xff] %vm64_vm1, %v697_v32 }
 0x1b9   :  { %900 = vmatmul.msk.f32.gmra.mxu2 %vm318_vm2, %v550_v33 }
 0x1bc   :  { %v501_v34 = vpop.f32.mrf.mxu1  ;;  %v699_v35 = vpop.f32.mrf.mxu2 }
 0x1bd   :  { %v502_v36 = vadd.f32 %v1161_v28, %v501_v34  ;;  %v700_v37 = vadd.f32 %v1232_v22, %v699_v35 }
 0x1bf   :  { %v551_v38 = vmax.f32 %v502_v36, 0.0  ;;  %783 = vst.msk [vmem:[%s1431_s7 + $0x30] sm:$0xff] %vm64_vm1, %v700_v37 }
 0x1c1   :  { %901 = vmatmul.msk.f32.gmra.mxu2 %vm318_vm2, %v551_v38 }
 0x1c4   :  { %v702_v39 = vpop.f32.mrf.mxu2 }
 0x1c5   :  { %v703_v40 = vadd.f32 %v1232_v22, %v702_v39 }
 0x1c7   :  { %784 = vst.msk [vmem:[%s1431_s7 + $0x38] sm:$0xff] %vm64_vm1, %v703_v40 }
 0x1ca   :  { %v504_v41 = vpop.f32.mrf.mxu3 }
 0x1cb   :  { %v505_v42 = vadd.f32 %v1161_v28, %v504_v41 }
 0x1cc   :  { %v705_v43 = vpop.f32.mrf.mxu2 }
 0x1cd   :  { %v552_v44 = vmax.f32 %v505_v42, 0.0  ;;  %v706_v45 = vadd.f32 %v1232_v22, %v705_v43 }
 0x1cf   :  { %785 = vst.msk [vmem:[%s1431_s7 + $0x40] sm:$0xff] %vm64_vm1, %v706_v45  ;;  %902 = vmatmul.msk.f32.vlgmr.msra.gmra.mxu3 %vm318_vm2, %v552_v44 }
 0x1d2   :  { %v507_v46 = vpop.f32.mrf.mxu3 }
 0x1d3   :  { %v508_v47 = vadd.f32 %v1161_v28, %v507_v46 }
 0x1d4   :  { %v708_v48 = vpop.f32.mrf.mxu2 }
 0x1d5   :  { %v553_v49 = vmax.f32 %v508_v47, 0.0  ;;  %v709_v50 = vadd.f32 %v1232_v22, %v708_v48 }
 0x1d7   :  { %786 = vst.msk [vmem:[%s1431_s7 + $0x48] sm:$0xff] %vm64_vm1, %v709_v50  ;;  %903 = vmatmul.msk.f32.gmra.mxu3 %vm318_vm2, %v553_v49 }
 0x1da   :  { %v510_v51 = vpop.f32.mrf.mxu3 }
 0x1db   :  { %v511_v52 = vadd.f32 %v1161_v28, %v510_v51 }
 0x1dc   :  { %v711_v53 = vpop.f32.mrf.mxu2 }
 0x1dd   :  { %v554_v54 = vmax.f32 %v511_v52, 0.0  ;;  %v712_v55 = vadd.f32 %v1232_v22, %v711_v53 }
 0x1df   :  { %787 = vst.msk [vmem:[%s1431_s7 + $0x50] sm:$0xff] %vm64_vm1, %v712_v55  ;;  %904 = vmatmul.msk.f32.gmra.mxu3 %vm318_vm2, %v554_v54 }
 0x1e2   :  { %v513_v56 = vpop.f32.mrf.mxu3 }
 0x1e3   :  { %v514_v57 = vadd.f32 %v1161_v28, %v513_v56 }
 0x1e4   :  { %v714_v58 = vpop.f32.mrf.mxu2 }
 0x1e5   :  { %v555_v59 = vmax.f32 %v514_v57, 0.0  ;;  %v715_v60 = vadd.f32 %v1232_v22, %v714_v58 }
 0x1e7   :  { %788 = vst.msk [vmem:[%s1431_s7 + $0x58] sm:$0xff] %vm64_vm1, %v715_v60  ;;  %905 = vmatmul.msk.f32.gmra.mxu3 %vm318_vm2, %v555_v59 }
 0x1ea   :  { %v516_v61 = vpop.f32.mrf.mxu3 }
 0x1eb   :  { %v517_v62 = vadd.f32 %v1161_v28, %v516_v61 }
 0x1ec   :  { %v717_v63 = vpop.f32.mrf.mxu2 }
 0x1ed   :  { %v556_v0 = vmax.f32 %v517_v62, 0.0  ;;  %v718_v1 = vadd.f32 %v1232_v22, %v717_v63 }
 0x1ef   :  { %789 = vst.msk [vmem:[%s1431_s7 + $0x60] sm:$0xff] %vm64_vm1, %v718_v1  ;;  %906 = vmatmul.msk.f32.gmra.mxu3 %vm318_vm2, %v556_v0 }
 0x1f2   :  { %v519_v2 = vpop.f32.mrf.mxu3 }
 0x1f3   :  { %v520_v3 = vadd.f32 %v1161_v28, %v519_v2 }
 0x1f4   :  { %v720_v4 = vpop.f32.mrf.mxu2 }
 0x1f5   :  { %v557_v5 = vmax.f32 %v520_v3, 0.0  ;;  %v721_v6 = vadd.f32 %v1232_v22, %v720_v4 }
 0x1f7   :  { %790 = vst.msk [vmem:[%s1431_s7 + $0x68] sm:$0xff] %vm64_vm1, %v721_v6  ;;  %907 = vmatmul.msk.f32.gmra.mxu3 %vm318_vm2, %v557_v5 }
 0x1fa   :  { %v522_v7 = vpop.f32.mrf.mxu3 }
 0x1fb   :  { %v523_v8 = vadd.f32 %v1161_v28, %v522_v7 }
 0x1fc   :  { %v723_v9 = vpop.f32.mrf.mxu2 }
 0x1fd   :  { %v558_v10 = vmax.f32 %v523_v8, 0.0  ;;  %v724_v11 = vadd.f32 %v1232_v22, %v723_v9 }
 0x1ff   :  { %791 = vst.msk [vmem:[%s1431_s7 + $0x70] sm:$0xff] %vm64_vm1, %v724_v11  ;;  %908 = vmatmul.msk.f32.gmra.mxu3 %vm318_vm2, %v558_v10 }
 0x202   :  { %v525_v12 = vpop.f32.mrf.mxu3 }
 0x203   :  { %v526_v13 = vadd.f32 %v1161_v28, %v525_v12 }
 0x204   :  { %v726_v14 = vpop.f32.mrf.mxu2 }
 0x205   :  { %v559_v15 = vmax.f32 %v526_v13, 0.0  ;;  %v727_v16 = vadd.f32 %v1232_v22, %v726_v14 }
 0x207   :  { %792 = vst.msk [vmem:[%s1431_s7 + $0x78] sm:$0xff] %vm64_vm1, %v727_v16  ;;  %909 = vmatmul.msk.f32.gmra.mxu3 %vm318_vm2, %v559_v15 }
 0x20c   :  { %v729_v17 = vpop.f32.mrf.mxu2 }
 0x20d   :  { %v730_v18 = vadd.f32 %v1232_v22, %v729_v17 }
 0x20f   :  { %793 = vst.msk [vmem:[%s1431_s7 + $0x80] sm:$0xff] %vm64_vm1, %v730_v18 }
 0x214   :  { %v732_v28 = vpop.f32.mrf.mxu2 }
 0x215   :  { %v733_v19 = vadd.f32 %v1232_v22, %v732_v28 }
 0x217   :  { %794 = vst.msk [vmem:[%s1431_s7 + $0x88] sm:$0xff] %vm64_vm1, %v733_v19 }
 0x21c   :  { %v735_v20 = vpop.f32.mrf.mxu2 }
 0x21d   :  { %v736_v21 = vadd.f32 %v1232_v22, %v735_v20 }
 0x21f   :  { %795 = vst.msk [vmem:[%s1431_s7 + $0x90] sm:$0xff] %vm64_vm1, %v736_v21 }
 0x224   :  { %v738_v23 = vpop.f32.mrf.mxu2 }
 0x225   :  { %v739_v24 = vadd.f32 %v1232_v22, %v738_v23 }
 0x227   :  { %796 = vst.msk [vmem:[%s1431_s7 + $0x98] sm:$0xff] %vm64_vm1, %v739_v24 }
 0x22c   :  { %v741_v25 = vpop.f32.mrf.mxu2 }
 0x22d   :  { %v742_v26 = vadd.f32 %v1232_v22, %v741_v25 }
 0x22f   :  { %797 = vst.msk [vmem:[%s1431_s7 + $0xa0] sm:$0xff] %vm64_vm1, %v742_v26 }
 0x234   :  { %v744_v27 = vpop.f32.mrf.mxu2 }
 0x235   :  { %v745_v29 = vadd.f32 %v1232_v22, %v744_v27 }
 0x237   :  { %798 = vst.msk [vmem:[%s1431_s7 + $0xa8] sm:$0xff] %vm64_vm1, %v745_v29 }
 0x23c   :  { %v747_v30 = vpop.f32.mrf.mxu2 }
 0x23d   :  { %v748_v31 = vadd.f32 %v1232_v22, %v747_v30 }
 0x23f   :  { %799 = vst.msk [vmem:[%s1431_s7 + $0xb0] sm:$0xff] %vm64_vm1, %v748_v31 }
 0x244   :  { %v750_v32 = vpop.f32.mrf.mxu2 }
 0x245   :  { %v751_v33 = vadd.f32 %v1232_v22, %v750_v32 }
 0x247   :  { %800 = vst.msk [vmem:[%s1431_s7 + $0xb8] sm:$0xff] %vm64_vm1, %v751_v33 }
 0x252   :  { %v753_v34 = vpop.f32.mrf.mxu3 }
 0x253   :  { %v754_v35 = vadd.f32 %v1232_v22, %v753_v34 }
 0x255   :  { %801 = vst.msk [vmem:[%s1431_s7 + $0xc0] sm:$0xff] %vm64_vm1, %v754_v35 }
 0x25a   :  { %v756_v36 = vpop.f32.mrf.mxu3 }
 0x25b   :  { %v757_v37 = vadd.f32 %v1232_v22, %v756_v36 }
 0x25d   :  { %802 = vst.msk [vmem:[%s1431_s7 + $0xc8] sm:$0xff] %vm64_vm1, %v757_v37 }
 0x262   :  { %v759_v38 = vpop.f32.mrf.mxu3 }
 0x263   :  { %v760_v39 = vadd.f32 %v1232_v22, %v759_v38 }
 0x265   :  { %803 = vst.msk [vmem:[%s1431_s7 + $0xd0] sm:$0xff] %vm64_vm1, %v760_v39 }
 0x26a   :  { %v762_v40 = vpop.f32.mrf.mxu3 }
 0x26b   :  { %v763_v41 = vadd.f32 %v1232_v22, %v762_v40 }
 0x26d   :  { %804 = vst.msk [vmem:[%s1431_s7 + $0xd8] sm:$0xff] %vm64_vm1, %v763_v41 }
 0x272   :  { %v765_v42 = vpop.f32.mrf.mxu3 }
 0x273   :  { %v766_v43 = vadd.f32 %v1232_v22, %v765_v42 }
 0x275   :  { %805 = vst.msk [vmem:[%s1431_s7 + $0xe0] sm:$0xff] %vm64_vm1, %v766_v43 }
 0x27a   :  { %v768_v44 = vpop.f32.mrf.mxu3 }
 0x27b   :  { %v769_v45 = vadd.f32 %v1232_v22, %v768_v44 }
 0x27d   :  { %806 = vst.msk [vmem:[%s1431_s7 + $0xe8] sm:$0xff] %vm64_vm1, %v769_v45 }
 0x282   :  { %v771_v46 = vpop.f32.mrf.mxu3 }
 0x283   :  { %v772_v47 = vadd.f32 %v1232_v22, %v771_v46 }
 0x285   :  { %807 = vst.msk [vmem:[%s1431_s7 + $0xf0] sm:$0xff] %vm64_vm1, %v772_v47 }
 0x28a   :  { %v774_v48 = vpop.f32.mrf.mxu3 }
 0x28b   :  { %v775_v49 = vadd.f32 %v1232_v22, %v774_v48 }
 0x28d   :  { %808 = vst.msk [vmem:[%s1431_s7 + $0xf8] sm:$0xff] %vm64_vm1, %v775_v49 }

</bundles_post_ra>
